<compile_context>
chip_gen: v5e
topology: v5e:2x2
jax: 0.10.0
libtpu: 0.0.40
codegen_flags: <defaults>
</compile_context>

<pallas_src>
import jax
import jax.numpy as jnp
from jax.experimental import pallas as pl
from jax.experimental.pallas import tpu as pltpu

_LANES = 128


def _bce_with_logits_kernel(x_ref, y_ref, o_ref):
    x = x_ref[...].astype(jnp.float32)
    y = y_ref[...].astype(jnp.float32)
    # Numerically stable BCE-with-logits (matches PyTorch):
    #   loss = max(x, 0) - x*y + log1p(exp(-|x|))
    loss = jnp.maximum(x, 0.0) - x * y + jnp.log1p(jnp.exp(-jnp.abs(x)))
    o_ref[...] = loss.astype(o_ref.dtype)


def _round_up(n, m):
    return ((n + m - 1) // m) * m


def _pick_tile_rows(rows, tile_rows):
    """Pick a block row count: multiple of 8, big, and >=2 grid steps if possible."""
    if rows <= 8:
        # Tiny input: a single block equal to the full array dim.
        return rows
    tr = _round_up(min(tile_rows, rows), 8)
    # Keep at least 2 grid iterations so the parallel axis can be split
    # across the two TensorCores on v7x.
    if pl.cdiv(rows, tr) < 2:
        tr = _round_up(pl.cdiv(rows, 2), 8)
    return tr


def _bce_2d(x2d, y2d, out_dtype, tile_rows):
    rows, lanes = x2d.shape
    tr = _pick_tile_rows(rows, tile_rows)
    grid = (pl.cdiv(rows, tr),)

    return pl.pallas_call(
        _bce_with_logits_kernel,
        out_shape=jax.ShapeDtypeStruct((rows, lanes), out_dtype),
        grid_spec=pl.GridSpec(
            grid=grid,
            in_specs=[
                pl.BlockSpec((tr, lanes), lambda i: (i, 0)),
                pl.BlockSpec((tr, lanes), lambda i: (i, 0)),
            ],
            out_specs=pl.BlockSpec((tr, lanes), lambda i: (i, 0)),
        ),
        compiler_params=pltpu.CompilerParams(
            dimension_semantics=("parallel",),
        ),
    )(x2d, y2d)


def binary_cross_entropy_with_logits(logits, labels, *, tile_rows=4096):
    assert logits.shape == labels.shape, "logits/labels must have the same shape"
    orig_shape = logits.shape
    orig_dtype = logits.dtype

    total = 1
    for d in orig_shape:
        total *= d

    if total % _LANES == 0:
        # Fast path: no padding, no output slicing (no extra HBM passes).
        rows = total // _LANES
        x2d = logits.reshape(rows, _LANES)
        y2d = labels.reshape(rows, _LANES)
        out2d = _bce_2d(x2d, y2d, orig_dtype, tile_rows)
        return out2d.reshape(orig_shape)

    # Ragged path: pad only up to the next multiple of 128 lanes; the partial
    # tail along the row axis is handled by the cdiv grid's masked last block.
    padded_total = _round_up(total, _LANES)
    pad = padded_total - total
    rows = padded_total // _LANES
    x2d = jnp.pad(jnp.ravel(logits), (0, pad)).reshape(rows, _LANES)
    y2d = jnp.pad(jnp.ravel(labels), (0, pad)).reshape(rows, _LANES)
    out2d = _bce_2d(x2d, y2d, orig_dtype, tile_rows)
    return out2d.reshape(-1)[:total].reshape(orig_shape)


def _reference_bce(logits, labels):
    x = logits.astype(jnp.float32)
    y = labels.astype(jnp.float32)
    return (jnp.maximum(x, 0.0) - x * y + jnp.log1p(jnp.exp(-jnp.abs(x)))).astype(
        logits.dtype
    )


if __name__ == "__main__":
    key = jax.random.PRNGKey(0)
    k1, k2 = jax.random.split(key)

    # Small NCHW-shaped inputs consistent with the module's usage.
    shape = (2, 4, 16, 16)
    logits = jax.random.normal(k1, shape, dtype=jnp.float32) * 3.0
    labels = (jax.random.uniform(k2, shape) > 0.5).astype(jnp.float32)

    out = binary_cross_entropy_with_logits(logits, labels)
    out = jax.block_until_ready(out)

    ref = _reference_bce(logits, labels)
    assert out.shape == shape
    assert out.dtype == logits.dtype
    assert jnp.max(jnp.abs(out - ref)) < 1e-5

    # Also exercise a ragged (non-multiple-of-128) shape to cover the fallback path.
    shape2 = (3, 5, 7, 9)
    k3, k4 = jax.random.split(k2)
    lg2 = jax.random.normal(k3, shape2, dtype=jnp.float32) * 3.0
    lb2 = (jax.random.uniform(k4, shape2) > 0.5).astype(jnp.float32)
    out2 = jax.block_until_ready(binary_cross_entropy_with_logits(lg2, lb2))
    assert out2.shape == shape2
    assert jnp.max(jnp.abs(out2 - _reference_bce(lg2, lb2))) < 1e-5

    print("KERNEL_OK")
</pallas_src>

<mosaic_0001>
module attributes {stable_mosaic.version = 11 : i64} {
  func.func @_bce_with_logits_kernel(%arg0: i32, %arg1: memref<8x128xf32, #tpu.memory_space<vmem>>, %arg2: memref<8x128xf32, #tpu.memory_space<vmem>>, %arg3: memref<8x128xf32, #tpu.memory_space<vmem>>) attributes {dimension_semantics = [#tpu.dimension_semantics<parallel>], iteration_bounds = array<i64: 2>, scalar_prefetch = 0 : i64, scratch_operands = 0 : i64, tpu.core_type = #tpu.core_type<tc>, window_params = [{transform_indices = @transform_0, window_bounds = array<i64: 8, 128>}, {transform_indices = @transform_1, window_bounds = array<i64: 8, 128>}, {transform_indices = @transform_2, window_bounds = array<i64: 8, 128>}]} {
    %c0 = arith.constant 0 : index
    %c0_0 = arith.constant 0 : index
    %0 = vector.load %arg1[%c0, %c0_0] : memref<8x128xf32, #tpu.memory_space<vmem>>, vector<8x128xf32>
    %c0_1 = arith.constant 0 : index
    %c0_2 = arith.constant 0 : index
    %1 = vector.load %arg2[%c0_1, %c0_2] : memref<8x128xf32, #tpu.memory_space<vmem>>, vector<8x128xf32>
    %cst = arith.constant 0.000000e+00 : f32
    %2 = vector.broadcast %cst : f32 to vector<8x128xf32>
    %3 = arith.maximumf %0, %2 : vector<8x128xf32>
    %4 = arith.mulf %0, %1 : vector<8x128xf32>
    %5 = arith.subf %3, %4 : vector<8x128xf32>
    %6 = math.absf %0 : vector<8x128xf32>
    %cst_3 = arith.constant 0.000000e+00 : f32
    %7 = vector.broadcast %cst_3 : f32 to vector<8x128xf32>
    %8 = arith.subf %7, %6 : vector<8x128xf32>
    %9 = math.exp %8 : vector<8x128xf32>
    %10 = math.log1p %9 : vector<8x128xf32>
    %11 = arith.addf %5, %10 : vector<8x128xf32>
    %c0_4 = arith.constant 0 : index
    %c0_5 = arith.constant 0 : index
    %12 = vector.load %arg3[%c0_4, %c0_5] : memref<8x128xf32, #tpu.memory_space<vmem>>, vector<8x128xf32>
    tpu.vector_store %arg3[%c0_4, %c0_5], %11 {strides = array<i32>} : memref<8x128xf32, #tpu.memory_space<vmem>>, vector<8x128xf32>,
    return
  }
  func.func @transform_0(%arg0: i32) -> (i32, i32) {
    %c0_i32 = arith.constant 0 : i32
    %c0_i32_0 = arith.constant 0 : i32
    return %arg0, %c0_i32 : i32, i32
  }
  func.func @transform_1(%arg0: i32) -> (i32, i32) {
    %c0_i32 = arith.constant 0 : i32
    %c0_i32_0 = arith.constant 0 : i32
    return %arg0, %c0_i32 : i32, i32
  }
  func.func @transform_2(%arg0: i32) -> (i32, i32) {
    %c0_i32 = arith.constant 0 : i32
    %c0_i32_0 = arith.constant 0 : i32
    return %arg0, %c0_i32 : i32, i32
  }
}

</mosaic_0001>

<bundles_post_ra>
// kernel: tpu_custom_call.1
= control target key start
LH: loop header
LB: loop body
LE: loop exit
PB: predicated region body
PF: predicated region fallthrough
CT: control target
= control target key end

     0   :  { %7 = vsyncpa [#allocation3], 0  ;;  %s711_s0 = inlined_call_operand.hbm [shape: f32[16,128], index: 0, kind: input, shape index: {}]   ;;  %s712_s1 = inlined_call_operand.hbm [shape: f32[16,128], index: 1, kind: input, shape index: {}]   ;;  %s713_s2 = inlined_call_operand.hbm [shape: f32[16,128], index: 2, kind: output, shape index: {}]  }
   0x1   :  { %9 = vsyncpa [#allocation3 + $0x1], 0 }
   0x2   :  { %10 = vsyncpa [#allocation6], 0 }
   0x3   :  { %12 = vsyncpa [#allocation6 + $0x1], 0 }
   0x4   :  { %13 = vsyncpa [#allocation4], 0 }
   0x5   :  { %15 = vsyncpa [#allocation4 + $0x1], 0  ;;  %s546_s9 = smov 0   ;;  %s548_s10 = smov 0  }
   0x6   :  { %s550_s11 = smov 0   ;;  %s552_s12 = smov 0  }
   0x7 LB: > { %s567_s13 = sadd.s32 4294967295, %s529_s12   ;;  %s329_s14 = sadd.s32 4294967294, %s529_s12   ;;  %s529_s12 = sphi %s552_s12, %s724_s12   ;;  %s525_s11 = sphi %s550_s11, %s723_s11   ;;  %s521_s10 = sphi %s548_s10, %s722_s10   ;;  %s517_s9 = sphi %s546_s9, %s721_s9  }
   0x8   : > { %s571_s15 = sadd.s32 1, %s529_s12   ;;  %s28_s16 = sadd.s32 1, %s525_s11 }
   0x9   : > { %s25_s17 = ssub.s32 %s529_s12, %s571_s15  ;;  %p35_p0 = scmp.ne.s32.totalorder %s525_s11, %s521_s10 }
   0xa   : > { %p26_p1 = scmp.eq.s32.totalorder %s25_s17, 0  ;;  %p36_p2 = scmp.eq.s32.totalorder %s529_s12, 0 }
   0xb   : > { %p41_p3 = scmp.ne.s32.totalorder %s521_s10, %s517_s9  ;;  %p42_p4 = scmp.eq.s32.totalorder %s567_s13, 0 }
   0xc   : > { %s583_s18 = scalar_select %p26_p1, %s525_s11, %s28_s16  }
   0xd   : > { %p585_p5 = por %p36_p2, %p35_p0  ;;  %p589_p6 = por %p42_p4, %p41_p3 }
   0xe   : > { %p91_p7 = scmp.eq.s32.totalorder %s567_s13, 1  ;;  %p97_p8 = scmp.eq.s32.totalorder %s329_s14, 1 }
   0xf   : > { %p361_p10 = scmp.lt.s32.totalorder %s529_s12, 2  ;;  %s605_s23 = sand.u32 1, %s525_s11  }
  0x10   : > { %p596_p11 = por %p91_p7, %p35_p0  ;;  %p600_p12 = por %p97_p8, %p41_p3 }
  0x11   : > { %s333_s24 = sshll.u32 %s529_s12, 3  ;;  %s332_s25 = sshll.u32 %s605_s23, 3 }
  0x12   : > { %s125_s28 = scalar_lea.hbm %s711_s0, %s333_s24  ;;  %s121_s30 = scalar_lea.vmem [#allocation2], %s332_s25 }
  0x13   : > { %s127_s29 = sshll.u32 %s125_s28, 4  ;;  %s129_s3 = sshll.u32 %s121_s30, 4  ;;  %s128_s29 = int_to_ptr.hbm [resolvable:$true] %s127_s29  ;;  %s130_s3 = int_to_ptr.vmem [resolvable:$true] %s129_s3 }
  0x14   : > { %p614_p13 = pnand %p361_p10, %p585_p5  ;;  %p336_p0 = scmp.ge.s32.totalorder %s529_s12, 1 }
  0x15   : > { %p153_p1 = scmp.lt.s32.totalorder %s529_s12, 3  ;;  %s118_s5 = scalar_lea.sflag [#allocation3], %s605_s23 }
  0x16   : > { %s399_s6 = sshra.s32 %s128_s29, 4  ;;  %p403_p3 = pneg %p614_p13  ;;  %s400_s6 = int_to_ptr.hbm [resolvable:$true] %s399_s6 }
  0x17   : > { %s401_s7 = scalar_lea.hbm %s400_s6, 8  ;;  %s406_s16 = scalar_lea.hbm %s711_s0, 16 }
  0x18   : > { %p402_p2 = scmp.ne.s32.totalorder %s400_s6, %s401_s7  ;;  %p407_p5 = scmp.lt.s32.totalorder %s400_s6, %s711_s0 }
  0x19   : > { %p408_p8 = scmp.lt.s32.totalorder %s406_s16, %s401_s7 }
  0x1a   : > { %p404_p4 = pnand %p403_p3, %p402_p2 }
  0x1b   : > { %p409_p10 = por %p408_p8, %p407_p5 }
  0x1c   : > { %p405_p7 = pneg %p404_p4 }
  0x1e   : > { %p410_p9 = pnand %p409_p10, %p405_p7 }
  0x20   : > { %413 = shalt.err (!%p410_p9)
}
  0x21   : > { %353 = dma.hbm_to_vmem [thread:$0]  (!%p614_p13), %s128_s29, 128, %s130_s3, %s118_s5  }
  0x22   : > { %p638_p2 = pnand %p336_p0, %p153_p1  ;;  %s144_s30 = scalar_lea.hbm %s712_s1, %s333_s24 }
  0x23   : > { %s146_s6 = sshll.u32 %s144_s30, 4  ;;  %s140_s7 = scalar_lea.vmem [#allocation5], %s332_s25  ;;  %s147_s6 = int_to_ptr.hbm [resolvable:$true] %s146_s6 }
  0x24   : > { %s148_s8 = sshll.u32 %s140_s7, 4  ;;  %s137_s14 = scalar_lea.sflag [#allocation6], %s605_s23  ;;  %s149_s8 = int_to_ptr.vmem [resolvable:$true] %s148_s8 }
  0x25   : > { %s429_s16 = sshra.s32 %s147_s6, 4  ;;  %s436_s5 = scalar_lea.hbm %s712_s1, 16  ;;  %s430_s16 = int_to_ptr.hbm [resolvable:$true] %s429_s16 }
  0x26   : > { %s431_s17 = scalar_lea.hbm %s430_s16, 8  ;;  %p437_p4 = scmp.lt.s32.totalorder %s430_s16, %s712_s1 }
  0x27   : > { %p432_p9 = scmp.ne.s32.totalorder %s430_s16, %s431_s17  ;;  %p438_p7 = scmp.lt.s32.totalorder %s436_s5, %s431_s17 }
  0x29   : > { %p434_p0 = pnand %p432_p9, %p403_p3  ;;  %p439_p5 = por %p438_p7, %p437_p4 }
  0x2b   : > { %p435_p1 = pneg %p434_p0 }
  0x2d   : > { %p440_p8 = pnand %p439_p5, %p435_p1 }
  0x2f   : > { %443 = shalt.err (!%p440_p8)
}
  0x30   : > { %356 = dma.hbm_to_vmem [thread:$0]  (!%p614_p13), %s147_s6, 128, %s149_s8, %s137_s14  }
  0x31   : > { %157 = sbr.rel (%p638_p2) target bundleno = 88 (0x58), region = 28  ;;  %s660_s23 = sand.u32 (!%p638_p2), 1, %s521_s10  }
  0x32   : > { %s663_s25 = sshll.u32 (!%p638_p2), %s660_s23, 3  ;;  %s160_s27 = scalar_lea.sflag (!%p638_p2), [#allocation3], %s660_s23 }
  0x33   : > { %s163_s28 = scalar_lea.vmem (!%p638_p2), [#allocation2], %s663_s25 }
  0x36   : > { %504 = dma.done.wait (%p589_p6), %s160_s27, 128  }
  0x37   : > { %506 = vsyncadd (%p589_p6), %s160_s27, 4294967168  ;;  %s170_s4 = scalar_lea.sflag [#allocation6], %s660_s23  ;;  %s173_s26 = scalar_lea.vmem [#allocation5], %s663_s25 }
  0x38   : > { %508 = dma.done.wait (%p589_p6), %s170_s4, 128  }
  0x39   : > { %510 = vsyncadd (%p589_p6), %s170_s4, 4294967168  ;;  %v200_v0 = vld [vmem:[%s163_s28] sm:$0xff]  ;;  %v201_v7 = vld [vmem:[%s173_s26] sm:$0xff]  ;;  %s341_s30 = sshll.u32 %s567_s13, 3  ;;  %s199_s8 = scalar_lea.vmem [#allocation7], %s663_s25 }
  0x3a   : > { %v205_v1 = vand.u32 2147483647, %v200_v0  ;;  %v202_v9 = vmax.f32 %v200_v0, 0.0  ;;  %v203_v10 = vmul.f32 %v201_v7, %v200_v0  ;;  %s231_s7 = scalar_lea.hbm %s713_s2, %s341_s30  ;;  %s233_s14 = sshll.u32 %s199_s8, 4  ;;  %s234_s14 = int_to_ptr.vmem [resolvable:$true] %s233_s14 }
  0x3b   : > { %s235_s16 = sshll.u32 %s231_s7, 4  ;;  %s221_s13 = scalar_lea.sflag [#allocation4], %s660_s23  ;;  %s236_s16 = int_to_ptr.hbm [resolvable:$true] %s235_s16 }
  0x3c   : > { %v206_v2 = vsub.f32 0.0, %v205_v1  ;;  %v204_v14 = vsub.f32 %v202_v9, %v203_v10  ;;  %s473_s17 = sshra.s32 %s236_s16, 4  ;;  %s479_s19 = scalar_lea.hbm %s713_s2, 16  ;;  %s474_s17 = int_to_ptr.hbm [resolvable:$true] %s473_s17 }
  0x3d   : > { %s475_s29 = scalar_lea.hbm %s474_s17, 8  ;;  %p480_p10 = scmp.lt.s32.totalorder %s474_s17, %s713_s2 }
  0x3e   : > { %v207_v3 = vmul.f32 1.442695, %v206_v2  ;;  %p476_p6 = scmp.ne.s32.totalorder %s474_s17, %s475_s29  ;;  %p481_p2 = scmp.lt.s32.totalorder %s479_s19, %s475_s29 }
  0x40   : > { %395 = vpow2.f32 %v207_v3  ;;  %p477_p13 = pnand %p476_p6, %p596_p11  ;;  %p482_p9 = por %p481_p2, %p480_p10 }
  0x42   : > { %p478_p3 = pneg %p477_p13 }
  0x44   : > { %p483_p0 = pnand %p482_p9, %p478_p3 }
  0x46   : > { %v396_v4 = vpop.eup %395 }
  0x47   : > { %v209_v5 = vadd.f32 1.0, %v396_v4  ;;  %v212_v6 = vmul.f32 -0.5, %v396_v4  ;;  %v215_v11 = vand.u32 2147483647, %v396_v4 }
  0x49   : > { %397 = vlog2.f32 %v209_v5  ;;  %v213_v8 = vadd.f32 1.0, %v212_v6  ;;  %vm216_vm0 = vcmp.lt.f32.partialorder %v215_v11, 0.0004427343 }
  0x4b   : > { %v214_v12 = vmul.f32 %v396_v4, %v213_v8 }
  0x4f   : > { %v398_v13 = vpop.eup %397 }
  0x50   : > { %v211_v15 = vmul.f32 0.6931472, %v398_v13 }
  0x52   : > { %v217_v16 = vsel %vm216_vm0, %v214_v12, %v211_v15 }
  0x53   : > { %v218_v17 = vadd.f32 %v217_v16, %v204_v14 }
  0x55   : > { %219 = vst [vmem:[%s199_s8] sm:$0xff] %v218_v17 }
  0x56   : > { %486 = shalt.err (!%p483_p0)
}
  0x57   : > { %348 = dma.vmem_to_hbm [thread:$0]  (%p596_p11), %s234_s14, 128, %s236_s16, %s221_s13  }
  0x58 PF: > { %s247_s23 = sand.u32 1, %s517_s9   ;;  %p720_p1 = scmp.ge.s32.totalorder %s529_s12, 2 }
  0x59   : > { %s248_s27 = scalar_lea.sflag [#allocation4], %s247_s23 }
  0x5a   : > { %p358_p4 = pnand %p720_p1, %p600_p12 }
  0x5c   : > { %p359_p7 = pneg %p358_p4 }
  0x5e   : > { %512 = dma.done.wait (%p359_p7), %s248_s27, 128  }
  0x5f   : > { %514 = vsyncadd (%p359_p7), %s248_s27, 4294967168  ;;  %p18_p5 = scmp.ge.s32.totalorder %s571_s15, 4   ;;  %s721_s9 = smov %s521_s10 }
  0x60   : > { %s722_s10 = smov %s525_s11  ;;  %s723_s11 = smov %s583_s18 }
  0x61   : > { %s724_s12 = smov %s571_s15  ;;  %20 = sbr.rel (!%p18_p5) target bundleno = 7 (0x7), region = 86 }
  0x66   :  { %254 = vsyncpa [#allocation3], 1 }
  0x67   :  { %256 = vsyncpa [#allocation3 + $0x1], 1 }
  0x68   :  { %257 = vsyncpa [#allocation6], 1 }
  0x69   :  { %259 = vsyncpa [#allocation6 + $0x1], 1 }
  0x6a   :  { %260 = vsyncpa [#allocation4], 1 }
  0x6b   :  { %262 = vsyncpa [#allocation4 + $0x1], 1 }

</bundles_post_ra>
